<compile_context>
chip_gen: v7x
topology: tpu7x:2x2x1
jax: 0.10.0
libtpu: 0.0.40
codegen_flags: <defaults>
</compile_context>

<pallas_src>
import jax
import jax.numpy as jnp
from jax.experimental import pallas as pl
from jax.experimental.pallas import tpu as pltpu

# TODO(synk): len(MoveEnum) is undefined in the original source; assuming 8.
NUM_MOVES = 8            # output dim = NUM_MOVES + 1
LANE = 128               # lane width (last-dim tile)
SUBLANE = 8              # f32 sublane height
MAX_BATCH_TILE = 1024    # batch rows per grid step (pipelining granule)


def _round_up(n, m):
    return ((n + m - 1) // m) * m


def qnet_kernel(x_ref, w1_ref, w2_ref, w3_ref, b_ref, o_ref):
    """One batch tile per grid step.

    x_ref : (tb, d_in) f32        (feature dim NOT padded)
    w*_ref: (in, out) bf16, lane-padded, grid-invariant
    b_ref : (3, maxw) f32, rows = [b1, b2, b3] zero-padded, grid-invariant
    o_ref : (tb, pout) f32, lane-dense unmasked store
    """
    ph1 = w1_ref.shape[1]
    ph2 = w2_ref.shape[1]
    pout = w3_ref.shape[1]
    b = b_ref[...]                                         # (3, maxw) f32

    # bf16 x bf16 -> f32 accumulate on the MXU; bias + ReLU in f32 on the VPU.
    x = x_ref[...].astype(w1_ref.dtype)
    h = jnp.dot(x, w1_ref[...], preferred_element_type=jnp.float32)
    h = jnp.maximum(h + b[0:1, :ph1], 0.0)
    h = jnp.dot(h.astype(w2_ref.dtype), w2_ref[...],
                preferred_element_type=jnp.float32)
    h = jnp.maximum(h + b[1:2, :ph2], 0.0)
    out = jnp.dot(h.astype(w3_ref.dtype), w3_ref[...],
                  preferred_element_type=jnp.float32)
    o_ref[...] = (out + b[2:3, :pout]).astype(o_ref.dtype)


@jax.jit
def qnet_forward_padded(x, w1, w2, w3, b_packed):
    """x: (B, d_in) f32; w*: pre-padded bf16 (in, out); b_packed: (3, maxw) f32.

    Returns the padded (bp, pout) f32 output. Rows >= B are padding; columns
    >= d_out are exactly zero. Consumers should read cols 0..d_out-1 directly
    instead of forcing a full slice/copy pass.
    """
    B, d_in = x.shape
    ph1, ph2, pout = w1.shape[1], w2.shape[1], w3.shape[1]

    # Adaptive batch tiling: big tiles to amortize per-step overhead, but keep
    # at least 2 grid steps when the batch allows it (v7x megacore sharding).
    bp = _round_up(max(B, SUBLANE), SUBLANE)
    if bp >= 2 * SUBLANE:
        tb = min(MAX_BATCH_TILE, _round_up(pl.cdiv(bp, 2), SUBLANE))
    else:
        tb = bp
    bp = _round_up(bp, tb)
    nb = bp // tb

    xp = x if bp == B else jnp.pad(x, ((0, bp - B), (0, 0)))

    # Grid-invariant full blocks for weights / packed biases (stay resident).
    full = lambda a: pl.BlockSpec(a.shape, lambda i: (0, 0))

    flops = 2 * bp * (d_in * ph1 + ph1 * ph2 + ph2 * pout)
    bytes_accessed = (
        xp.size * xp.dtype.itemsize
        + w1.size * w1.dtype.itemsize
        + w2.size * w2.dtype.itemsize
        + w3.size * w3.dtype.itemsize
        + b_packed.size * b_packed.dtype.itemsize
        + bp * pout * 4
    )

    return pl.pallas_call(
        qnet_kernel,
        out_shape=jax.ShapeDtypeStruct((bp, pout), jnp.float32),
        grid=(nb,),
        in_specs=[
            # Batch-tiled activations; last dim == full array dim (no feature pad).
            pl.BlockSpec((tb, d_in), lambda i: (i, 0)),
            full(w1), full(w2), full(w3), full(b_packed),
        ],
        out_specs=pl.BlockSpec((tb, pout), lambda i: (i, 0)),
        compiler_params=pltpu.CompilerParams(
            dimension_semantics=("parallel",),      # megacore-shardable batch axis
        ),
        cost_estimate=pl.CostEstimate(
            flops=int(flops), transcendentals=0, bytes_accessed=int(bytes_accessed)
        ),
    )(xp, w1, w2, w3, b_packed)


def init_raw_params(key, input_size):
    """nn.Linear-style U(-1/sqrt(fan_in), 1/sqrt(fan_in)) init, (in, out) layout."""
    h1, h2, d_out = input_size // 2, input_size // 4, NUM_MOVES + 1
    dims = [(input_size, h1), (h1, h2), (h2, d_out)]
    ws, bs = [], []
    for fan_in, fan_out in dims:
        key, kw, kb = jax.random.split(key, 3)
        bound = fan_in ** -0.5
        ws.append(jax.random.uniform(kw, (fan_in, fan_out), jnp.float32, -bound, bound))
        bs.append(jax.random.uniform(kb, (fan_out,), jnp.float32, -bound, bound))
    return ws, bs


def pack_params(ws, bs, weight_dtype=jnp.bfloat16):
    """One-time padding/packing (done at init, NOT per forward call).

    Weights -> lane-padded (in, out) tiles in `weight_dtype` (zero padding is
    exact for Linear+ReLU chains).  Biases -> a single (3, maxw) f32 block.
    """
    d_in = ws[0].shape[0]
    ph1 = _round_up(ws[0].shape[1], LANE)
    ph2 = _round_up(ws[1].shape[1], LANE)
    pout = _round_up(ws[2].shape[1], LANE)
    row_dims = (d_in, ph1, ph2)          # first weight keeps unpadded d_in rows
    col_dims = (ph1, ph2, pout)

    packed_ws = []
    for w, rows, cols in zip(ws, row_dims, col_dims):
        wp = jnp.pad(w, ((0, rows - w.shape[0]), (0, cols - w.shape[1])))
        packed_ws.append(wp.astype(weight_dtype))

    maxw = max(col_dims)
    b_packed = jnp.zeros((3, maxw), jnp.float32)
    for i, b in enumerate(bs):
        b_packed = b_packed.at[i, : b.shape[0]].set(b)

    return {"w1": packed_ws[0], "w2": packed_ws[1], "w3": packed_ws[2],
            "b": b_packed, "d_out": ws[2].shape[1]}


def reference_forward(x, ws, bs):
    """Plain-JAX reference with the same bf16-weight / f32-accumulate numerics."""
    bf16, f32 = jnp.bfloat16, jnp.float32
    h = x
    for i, (w, b) in enumerate(zip(ws, bs)):
        h = h.astype(bf16).astype(f32) @ w.astype(bf16).astype(f32) + b
        if i < 2:
            h = jnp.maximum(h, 0.0)
    return h


if __name__ == "__main__":
    key = jax.random.PRNGKey(0)
    batch = 2
    input_size = 32  # -> hidden dims 16, 8, output dim 9

    key, kx = jax.random.split(key)
    x = jax.random.normal(kx, (batch, input_size), jnp.float32)

    ws, bs = init_raw_params(key, input_size)
    params = pack_params(ws, bs)          # padded / packed once, reused per call

    # TODO(synk): the `action: str` argument of the original forward is unused
    # there (dead parameter), so it is not represented in the kernel.

    out_padded = qnet_forward_padded(x, params["w1"], params["w2"],
                                     params["w3"], params["b"])
    jax.block_until_ready(out_padded)

    d_out = params["d_out"]
    out = out_padded[:batch, :d_out]      # test-only view of the padded result

    ref = reference_forward(x, ws, bs)
    assert out.shape == (batch, NUM_MOVES + 1)
    assert jnp.allclose(out, ref, atol=1e-4, rtol=1e-3)
    # Padded output columns are exactly zero (zero weight/bias padding).
    assert jnp.all(out_padded[:, d_out:] == 0.0)

    print("KERNEL_OK")
</pallas_src>

<mosaic_0001>
module attributes {stable_mosaic.version = 11 : i64} {
  func.func @qnet_kernel(%arg0: i32, %arg1: memref<8x32xf32, #tpu.memory_space<vmem>>, %arg2: memref<32x128xbf16, #tpu.memory_space<vmem>>, %arg3: memref<128x128xbf16, #tpu.memory_space<vmem>>, %arg4: memref<128x128xbf16, #tpu.memory_space<vmem>>, %arg5: memref<3x128xf32, #tpu.memory_space<vmem>>, %arg6: memref<8x128xf32, #tpu.memory_space<vmem>>) attributes {dimension_semantics = [#tpu.dimension_semantics<parallel>], iteration_bounds = array<i64: 1>, scalar_prefetch = 0 : i64, scratch_operands = 0 : i64, tpu.core_type = #tpu.core_type<tc>, window_params = [{transform_indices = @transform_0, window_bounds = array<i64: 8, 32>}, {pipeline_mode = #tpu.pipeline_mode<synchronous>, transform_indices = @transform_1, window_bounds = array<i64: 32, 128>}, {pipeline_mode = #tpu.pipeline_mode<synchronous>, transform_indices = @transform_2, window_bounds = array<i64: 128, 128>}, {pipeline_mode = #tpu.pipeline_mode<synchronous>, transform_indices = @transform_3, window_bounds = array<i64: 128, 128>}, {pipeline_mode = #tpu.pipeline_mode<synchronous>, transform_indices = @transform_4, window_bounds = array<i64: 3, 128>}, {transform_indices = @transform_5, window_bounds = array<i64: 8, 128>}]} {
    %c0 = arith.constant 0 : index
    %c0_0 = arith.constant 0 : index
    %0 = vector.load %arg5[%c0, %c0_0] : memref<3x128xf32, #tpu.memory_space<vmem>>, vector<3x128xf32>
    %c0_1 = arith.constant 0 : index
    %c0_2 = arith.constant 0 : index
    %1 = vector.load %arg1[%c0_1, %c0_2] : memref<8x32xf32, #tpu.memory_space<vmem>>, vector<8x32xf32>
    %2 = arith.truncf %1 : vector<8x32xf32> to vector<8x32xbf16>
    %c0_3 = arith.constant 0 : index
    %c0_4 = arith.constant 0 : index
    %3 = vector.load %arg2[%c0_3, %c0_4] : memref<32x128xbf16, #tpu.memory_space<vmem>>, vector<32x128xbf16>
    %cst = arith.constant dense<0.000000e+00> : vector<8x128xf32>
    %4 = tpu.matmul %2, %3, %cst {dimension_numbers = #tpu.dot_dimension_numbers<[1], [0], [0], [1], [0, 0, 1, 1], [], []>} : vector<8x32xbf16>, vector<32x128xbf16>, vector<8x128xf32> -> vector<8x128xf32>
    %5 = vector.extract_strided_slice %0 {offsets = [0, 0], sizes = [1, 128], strides = [1, 1]} : vector<3x128xf32> to vector<1x128xf32>
    %6 = vector.broadcast %5 : vector<1x128xf32> to vector<8x128xf32>
    %7 = arith.addf %4, %6 : vector<8x128xf32>
    %cst_5 = arith.constant 0.000000e+00 : f32
    %8 = vector.broadcast %cst_5 : f32 to vector<8x128xf32>
    %9 = arith.maximumf %7, %8 : vector<8x128xf32>
    %10 = arith.truncf %9 : vector<8x128xf32> to vector<8x128xbf16>
    %c0_6 = arith.constant 0 : index
    %c0_7 = arith.constant 0 : index
    %11 = vector.load %arg3[%c0_6, %c0_7] : memref<128x128xbf16, #tpu.memory_space<vmem>>, vector<128x128xbf16>
    %cst_8 = arith.constant dense<0.000000e+00> : vector<8x128xf32>
    %12 = tpu.matmul %10, %11, %cst_8 {dimension_numbers = #tpu.dot_dimension_numbers<[1], [0], [0], [1], [0, 0, 1, 1], [], []>} : vector<8x128xbf16>, vector<128x128xbf16>, vector<8x128xf32> -> vector<8x128xf32>
    %13 = vector.extract_strided_slice %0 {offsets = [1, 0], sizes = [1, 128], strides = [1, 1]} : vector<3x128xf32> to vector<1x128xf32>
    %14 = vector.broadcast %13 : vector<1x128xf32> to vector<8x128xf32>
    %15 = arith.addf %12, %14 : vector<8x128xf32>
    %cst_9 = arith.constant 0.000000e+00 : f32
    %16 = vector.broadcast %cst_9 : f32 to vector<8x128xf32>
    %17 = arith.maximumf %15, %16 : vector<8x128xf32>
    %18 = arith.truncf %17 : vector<8x128xf32> to vector<8x128xbf16>
    %c0_10 = arith.constant 0 : index
    %c0_11 = arith.constant 0 : index
    %19 = vector.load %arg4[%c0_10, %c0_11] : memref<128x128xbf16, #tpu.memory_space<vmem>>, vector<128x128xbf16>
    %cst_12 = arith.constant dense<0.000000e+00> : vector<8x128xf32>
    %20 = tpu.matmul %18, %19, %cst_12 {dimension_numbers = #tpu.dot_dimension_numbers<[1], [0], [0], [1], [0, 0, 1, 1], [], []>} : vector<8x128xbf16>, vector<128x128xbf16>, vector<8x128xf32> -> vector<8x128xf32>
    %21 = vector.extract_strided_slice %0 {offsets = [2, 0], sizes = [1, 128], strides = [1, 1]} : vector<3x128xf32> to vector<1x128xf32>
    %22 = vector.broadcast %21 : vector<1x128xf32> to vector<8x128xf32>
    %23 = arith.addf %20, %22 : vector<8x128xf32>
    %c0_13 = arith.constant 0 : index
    %c0_14 = arith.constant 0 : index
    %24 = vector.load %arg6[%c0_13, %c0_14] : memref<8x128xf32, #tpu.memory_space<vmem>>, vector<8x128xf32>
    tpu.vector_store %arg6[%c0_13, %c0_14], %23 {strides = array<i32>} : memref<8x128xf32, #tpu.memory_space<vmem>>, vector<8x128xf32>,
    return
  }
  func.func @transform_0(%arg0: i32) -> (i32, i32) {
    %c0_i32 = arith.constant 0 : i32
    %c0_i32_0 = arith.constant 0 : i32
    return %arg0, %c0_i32 : i32, i32
  }
  func.func @transform_1(%arg0: i32) -> (i32, i32) {
    %c0_i32 = arith.constant 0 : i32
    %c0_i32_0 = arith.constant 0 : i32
    %c0_i32_1 = arith.constant 0 : i32
    return %c0_i32, %c0_i32_0 : i32, i32
  }
  func.func @transform_2(%arg0: i32) -> (i32, i32) {
    %c0_i32 = arith.constant 0 : i32
    %c0_i32_0 = arith.constant 0 : i32
    %c0_i32_1 = arith.constant 0 : i32
    return %c0_i32, %c0_i32_0 : i32, i32
  }
  func.func @transform_3(%arg0: i32) -> (i32, i32) {
    %c0_i32 = arith.constant 0 : i32
    %c0_i32_0 = arith.constant 0 : i32
    %c0_i32_1 = arith.constant 0 : i32
    return %c0_i32, %c0_i32_0 : i32, i32
  }
  func.func @transform_4(%arg0: i32) -> (i32, i32) {
    %c0_i32 = arith.constant 0 : i32
    %c0_i32_0 = arith.constant 0 : i32
    %c0_i32_1 = arith.constant 0 : i32
    return %c0_i32, %c0_i32_0 : i32, i32
  }
  func.func @transform_5(%arg0: i32) -> (i32, i32) {
    %c0_i32 = arith.constant 0 : i32
    %c0_i32_0 = arith.constant 0 : i32
    return %arg0, %c0_i32 : i32, i32
  }
}

</mosaic_0001>

<bundles_post_ra>
// kernel: qnet_forward_padded.1
= control target key start
LH: loop header
LB: loop body
LE: loop exit
PB: predicated region body
PF: predicated region fallthrough
CT: control target
= control target key end

     0   :  { %10 = vsyncpa [#allocation3], 0  ;;  %s707_s0 = inlined_call_operand.vmem [shape: f32[8,32], index: 0, kind: input, shape index: {}]   ;;  %s708_s1 = inlined_call_operand.hbm [shape: bf16[32,128], index: 1, kind: input, shape index: {}]   ;;  %s709_s2 = inlined_call_operand.hbm [shape: bf16[128,128], index: 2, kind: input, shape index: {}]   ;;  %s710_s3 = inlined_call_operand.hbm [shape: bf16[128,128], index: 3, kind: input, shape index: {}]   ;;  %s711_s4 = inlined_call_operand.vmem [shape: f32[3,128], index: 4, kind: input, shape index: {}]   ;;  %s712_s5 = inlined_call_operand.hbm [shape: f32[8,128], index: 5, kind: output, shape index: {}]  }
   0x1   :  { %11 = vsyncpa [#allocation6], 0 }
   0x2   :  { %12 = vsyncpa [#allocation4], 0  ;;  %s575_s18 = smov [#allocation5]   ;;  %s576_s20 = smov [#allocation2]  }
   0x3   :  { %s32_s19 = sshll.u32 %s575_s18, 4  ;;  %s20_s21 = sshll.u32 %s576_s20, 4  ;;  %s33_s19 = int_to_ptr.vmem [resolvable:$true] %s32_s19  ;;  %s613_s21 = int_to_ptr.vmem [resolvable:$true] %s20_s21 }
   0x4   :  { %s481_s24 = scalar_lea.hbm %s709_s2, 1024 }
   0x5   :  { %p482_p0 = scmp.ne.s32.totalorder %s709_s2, %s481_s24  ;;  %p485_p1 = scmp.lt.u32.totalorder %s481_s24, %s709_s2 }
   0x7   :  { %p487_p2 = pnand %p485_p1, %p482_p0 }
   0x9   :  { %490 = shalt.err (!%p487_p2)
}
   0xa   :  { %s491_s29 = scalar_lea.vmem %s33_s19, 1024  ;;  %p496_p4 = scmp.lt.s32.totalorder %s33_s19, %s33_s19 }
   0xb   :  { %p492_p3 = scmp.ne.s32.totalorder %s33_s19, %s491_s29  ;;  %p497_p5 = scmp.lt.s32.totalorder %s491_s29, %s491_s29 }
   0xd   :  { %p498_p6 = por %p497_p5, %p496_p4 }
   0xf   :  { %p499_p7 = pnand %p498_p6, %p492_p3 }
  0x11   :  { %502 = shalt.err (!%p499_p7)
}
  0x12   :  { %s577_s30 = smov 64   ;;  %s578_s6 = smov 4  }
  0x13   :  { %38 = dma.hbm_to_vmem [thread:$0]  %s709_s2, 1024, %s33_s19, [#allocation6], %s577_s30, %s577_s30, %s578_s6  }
  0x14   :  { %s503_s11 = scalar_lea.hbm %s708_s1, 256 }
  0x15   :  { %p504_p8 = scmp.ne.s32.totalorder %s708_s1, %s503_s11  ;;  %p507_p9 = scmp.lt.u32.totalorder %s503_s11, %s708_s1 }
  0x17   :  { %p509_p10 = pnand %p507_p9, %p504_p8 }
  0x19   :  { %512 = shalt.err (!%p509_p10)
}
  0x1a   :  { %s513_s16 = scalar_lea.vmem %s613_s21, 256  ;;  %p518_p12 = scmp.lt.s32.totalorder %s613_s21, %s613_s21 }
  0x1b   :  { %p514_p11 = scmp.ne.s32.totalorder %s613_s21, %s513_s16  ;;  %p519_p13 = scmp.lt.s32.totalorder %s513_s16, %s513_s16 }
  0x1d   :  { %p520_p0 = por %p519_p13, %p518_p12 }
  0x1f   :  { %p521_p1 = pnand %p520_p0, %p514_p11 }
  0x21   :  { %524 = shalt.err (!%p521_p1)
}
  0x22   :  { %26 = dma.hbm_to_vmem [thread:$0]  %s708_s1, 256, %s613_s21, [#allocation3], %s577_s30, %s577_s30, %s578_s6  }
  0x23   :  { %s579_s18 = smov [#allocation7]   ;;  %s525_s23 = scalar_lea.hbm %s710_s3, 1024 }
  0x24   :  { %s44_s19 = sshll.u32 %s579_s18, 4  ;;  %p526_p2 = scmp.ne.s32.totalorder %s710_s3, %s525_s23  ;;  %s45_s19 = int_to_ptr.vmem [resolvable:$true] %s44_s19 }
  0x25   :  { %p529_p3 = scmp.lt.u32.totalorder %s525_s23, %s710_s3 }
  0x27   :  { %p531_p4 = pnand %p529_p3, %p526_p2 }
  0x29   :  { %534 = shalt.err (!%p531_p4)
}
  0x2a   :  { %s535_s28 = scalar_lea.vmem %s45_s19, 1024  ;;  %p540_p6 = scmp.lt.s32.totalorder %s45_s19, %s45_s19 }
  0x2b   :  { %p536_p5 = scmp.ne.s32.totalorder %s45_s19, %s535_s28  ;;  %p541_p7 = scmp.lt.s32.totalorder %s535_s28, %s535_s28 }
  0x2d   :  { %p542_p8 = por %p541_p7, %p540_p6 }
  0x2f   :  { %p543_p9 = pnand %p542_p8, %p536_p5 }
  0x31   :  { %546 = shalt.err (!%p543_p9)
}
  0x32   :  { %50 = dma.hbm_to_vmem [thread:$0]  %s710_s3, 1024, %s45_s19, [#allocation6], %s577_s30, %s577_s30, %s578_s6  }
  0x33   :  { %569 = dma.done.wait [#allocation3], 256  }
  0x34   :  { %570 = vsyncadd [#allocation3], 4294967040 }
  0x35   :  { %571 = dma.done.wait [#allocation6], 2048  }
  0x36   :  { %572 = vsyncadd [#allocation6], 4294965248  ;;  %v580_v0 = vmov 0.0   ;;  %vm581_vm0 = vmmov 0   ;;  %v463_v1 = vld [vmem:[#allocation2] sm:$0xff]   ;;  %v464_v2 = vld [vmem:[#allocation2 + $0x8] sm:$0xff]   ;;  %v70_v19 = vlaneseq }
  0x37   :  { %407 = vmatprep.subr.bf16.mxu0 %v580_v0  ;;  %411 = vmatprep.mubr.msk.bf16.mxu0 %vm581_vm0, %v580_v0  ;;  %v64_v3 = vld [vmem:[%s707_s0] sm:$0xff]  ;;  %v465_v4 = vld [vmem:[#allocation5] sm:$0xff]   ;;  %v466_v6 = vld [vmem:[#allocation5 + $0x8] sm:$0xff]   ;;  %vm86_vm1 = vcmask 261120  }
  0x38   :  { %415 = vmatprep.subr.bf16.mxu1 %v580_v0  ;;  %431 = vmatprep.mubr.msk.bf16.mxu1 %vm581_vm0, %v580_v0  ;;  %v65_v5 = vpack.c.bf16 %v64_v3, %v64_v3  ;;  %v467_v7 = vld [vmem:[#allocation5 + $0x10] sm:$0xff]   ;;  %v468_v8 = vld [vmem:[#allocation5 + $0x18] sm:$0xff]   ;;  %v469_v9 = vld [vmem:[#allocation5 + $0x20] sm:$0xff]   ;;  %v71_v20 = vshrl.u32 %v70_v19, 7 }
  0x39   :  { %408 = vmatpush3.bf16.msra.mxu0 %v463_v1  ;;  %416 = vmatpush3.bf16.msra.mxu1 %v465_v4  ;;  %v470_v10 = vld [vmem:[#allocation5 + $0x28] sm:$0xff]   ;;  %v471_v11 = vld [vmem:[#allocation5 + $0x30] sm:$0xff]   ;;  %v472_v12 = vld [vmem:[#allocation5 + $0x38] sm:$0xff]  }
  0x3a   :  { %409 = vmatprep.subr.bf16.mxu0 %v580_v0  ;;  %417 = vmatprep.subr.bf16.mxu1 %v580_v0  ;;  %v473_v13 = vld [vmem:[#allocation7] sm:$0xff]   ;;  %v474_v14 = vld [vmem:[#allocation7 + $0x8] sm:$0xff]   ;;  %v475_v15 = vld [vmem:[#allocation7 + $0x10] sm:$0xff]   ;;  %v72_v21 = vsub.s32 0, %v71_v20  ;;  %v150_v33 = vsub.s32 1, %v71_v20  ;;  %v260_v42 = vsub.s32 2, %v71_v20 }
  0x3b   :  { %v476_v16 = vld [vmem:[#allocation7 + $0x18] sm:$0xff]   ;;  %v477_v17 = vld [vmem:[#allocation7 + $0x20] sm:$0xff]   ;;  %v478_v18 = vld [vmem:[#allocation7 + $0x28] sm:$0xff]  }
  0x3c   :  { %v63_v22 = vld [vmem:[%s711_s4] sm:$0x7]  ;;  %v480_v32 = vld [vmem:[#allocation7 + $0x38] sm:$0xff]   ;;  %s582_s4 = smov [#allocation8]  }
  0x3d   :  { %410 = vmatpush3.bf16.msra.mxu0 %v464_v2  ;;  %418 = vmatpush3.bf16.msra.mxu1 %v466_v6  ;;  %v73_v23 = vrot.slane %v63_v22, %v72_v21  ;;  %v479_v31 = vld [vmem:[#allocation7 + $0x30] sm:$0xff]   ;;  %v151_v34 = vrot.slane %v63_v22, %v150_v33  ;;  %v261_v43 = vrot.slane %v63_v22, %v260_v42  ;;  %s357_s6 = sshll.u32 %s582_s4, 4  ;;  %s358_s6 = int_to_ptr.vmem [resolvable:$true] %s357_s6 }
  0x3e   :  { %435 = vmatprep.subr.bf16.mxu0 %v580_v0  ;;  %419 = vmatprep.subr.bf16.mxu1 %v580_v0  ;;  %s547_s7 = scalar_lea.vmem %s358_s6, 128  ;;  %p552_p11 = scmp.lt.s32.totalorder %s358_s6, %s358_s6 }
  0x3f   :  { %p548_p10 = scmp.ne.s32.totalorder %s358_s6, %s547_s7  ;;  %p553_p12 = scmp.lt.s32.totalorder %s547_s7, %s547_s7 }
  0x40   :  { %412 = vmatmul.mubr.msk.bf16.vlgmr.msra.gmra.mrb[0].mxu0 %vm86_vm1, %v65_v5 }
  0x41   :  { %451 = vmatprep.mubr.msk.bf16.mxu0 %vm581_vm0, %v580_v0  ;;  %420 = vmatpush3.bf16.msra.mxu1 %v467_v7  ;;  %p554_p13 = por %p553_p12, %p552_p11 }
  0x42   :  { %421 = vmatprep.subr.bf16.mxu1 %v580_v0  ;;  %436 = vmatpush3.bf16.msra.mxu0 %v473_v13 }
  0x43   :  { %437 = vmatprep.subr.bf16.mxu0 %v580_v0  ;;  %p555_p0 = pnand %p554_p13, %p548_p10 }
  0x45   :  { %422 = vmatpush3.bf16.msra.mxu1 %v468_v8 }
  0x46   :  { %423 = vmatprep.subr.bf16.mxu1 %v580_v0  ;;  %438 = vmatpush3.bf16.msra.mxu0 %v474_v14 }
  0x47   :  { %439 = vmatprep.subr.bf16.mxu0 %v580_v0 }
  0x49   :  { %424 = vmatpush3.bf16.msra.mxu1 %v469_v9 }
  0x4a   :  { %425 = vmatprep.subr.bf16.mxu1 %v580_v0  ;;  %440 = vmatpush3.bf16.msra.mxu0 %v475_v15 }
  0x4b   :  { %441 = vmatprep.subr.bf16.mxu0 %v580_v0 }
  0x4d   :  { %426 = vmatpush3.bf16.msra.mxu1 %v470_v10 }
  0x4e   :  { %427 = vmatprep.subr.bf16.mxu1 %v580_v0  ;;  %442 = vmatpush3.bf16.msra.mxu0 %v476_v16 }
  0x4f   :  { %443 = vmatprep.subr.bf16.mxu0 %v580_v0 }
  0x51   :  { %428 = vmatpush3.bf16.msra.mxu1 %v471_v11 }
  0x52   :  { %429 = vmatprep.subr.bf16.mxu1 %v580_v0  ;;  %444 = vmatpush3.bf16.msra.mxu0 %v477_v17 }
  0x53   :  { %445 = vmatprep.subr.bf16.mxu0 %v580_v0 }
  0x55   :  { %430 = vmatpush3.bf16.msra.mxu1 %v472_v12 }
  0x56   :  { %446 = vmatpush3.bf16.msra.mxu0 %v478_v18 }
  0x57   :  { %447 = vmatprep.subr.bf16.mxu0 %v580_v0 }
  0x5a   :  { %448 = vmatpush3.bf16.msra.mxu0 %v479_v31 }
  0x5b   :  { %449 = vmatprep.subr.bf16.mxu0 %v580_v0 }
  0x5e   :  { %450 = vmatpush3.bf16.msra.mxu0 %v480_v32 }
 0x113   :  { %v124_v24 = vpop.f32.mrb[0].mxu0 }
 0x114   :  { %v125_v25 = vadd.f32 %v124_v24, %v73_v23  ;;  %v413_v26 = vpop.f32.mrb[1].mxu0 }
 0x115   :  { %v127_v27 = vpop.f32.mrb[2].mxu0 }
 0x116   :  { %v130_v28 = vmax.f32 %v125_v25, 0.0  ;;  %v414_v29 = vpop.f32.mrb[3].mxu0 }
 0x118   :  { %v131_v30 = vpack.c.bf16 %v130_v28, %v130_v28 }
 0x11a   :  { %432 = vmatmul.mubr.bf16.vlgmr.msra.gmra.mrb[0].mxu1 %v131_v30 }
 0x1ed   :  { %v234_v35 = vpop.f32.mrb[0].mxu1 }
 0x1ee   :  { %v235_v36 = vadd.f32 %v234_v35, %v151_v34  ;;  %v433_v37 = vpop.f32.mrb[1].mxu1 }
 0x1ef   :  { %v237_v38 = vpop.f32.mrb[2].mxu1 }
 0x1f0   :  { %v240_v39 = vmax.f32 %v235_v36, 0.0  ;;  %v434_v40 = vpop.f32.mrb[3].mxu1 }
 0x1f2   :  { %v241_v41 = vpack.c.bf16 %v240_v39, %v240_v39 }
 0x1f4   :  { %452 = vmatmul.mubr.bf16.vlgmr.msra.gmra.mrb[4].mxu0 %v241_v41 }
 0x2c7   :  { %v344_v44 = vpop.f32.mrb[4].mxu0 }
 0x2c8   :  { %v345_v45 = vadd.f32 %v344_v44, %v261_v43  ;;  %v453_v46 = vpop.f32.mrb[5].mxu0 }
 0x2c9   :  { %v347_v47 = vpop.f32.mrb[6].mxu0 }
 0x2ca   :  { %350 = vst [vmem:[#allocation8] sm:$0xff] %v345_v45  ;;  %v454_v48 = vpop.f32.mrb[7].mxu0 }
 0x2cb   :  { %558 = shalt.err (!%p555_p0)
}
 0x2cc   :  { %s559_s10 = scalar_lea.hbm %s712_s5, 128 }
 0x2cd   :  { %p560_p1 = scmp.ne.s32.totalorder %s712_s5, %s559_s10  ;;  %p563_p2 = scmp.lt.u32.totalorder %s559_s10, %s712_s5 }
 0x2cf   :  { %p565_p3 = pnand %p563_p2, %p560_p1 }
 0x2d1   :  { %568 = shalt.err (!%p565_p3)
}
 0x2d2   :  { %360 = dma.vmem_to_hbm [thread:$0]  %s358_s6, 128, %s712_s5, [#allocation4]  }
 0x2d3   :  { %573 = dma.done.wait [#allocation4], 128  }
 0x2d4   :  { %574 = vsyncadd [#allocation4], 4294967168 }
 0x2d5   :  { %364 = vsyncpa [#allocation3], 1 }
 0x2d6   :  { %365 = vsyncpa [#allocation6], 1 }
 0x2d7   :  { %366 = vsyncpa [#allocation4], 1 }

</bundles_post_ra>
